<compile_context>
chip_gen: v5e
topology: v5e:2x2
jax: 0.10.0
libtpu: 0.0.40
codegen_flags: <defaults>
</compile_context>

<pallas_src>
import jax
import jax.numpy as jnp
from jax.experimental import pallas as pl
from jax.experimental.pallas import tpu as pltpu

LANES = 128
MAX_TILE_BYTES = 4 * 1024 * 1024     # ~4 MiB of input per block per operand
CHUNK_ROWS = 512                     # rows per in-kernel accumulation chunk
VMEM_LIMIT_BYTES = 32 * 1024 * 1024  # raise v5e's 16 MiB scoped-VMEM default


def _cdiv(a, b):
    return -(-a // b)


def _round_up(a, b):
    return _cdiv(a, b) * b


def _tensorcores_per_device():
    """Best-effort TensorCores-per-JAX-device count.

    v5e/v6e expose one TensorCore per device; v7x has two per chip. Only on
    the latter do we add a CORE_PARALLEL axis (plain "parallel" does not
    actually shard work across TCs).
    """
    try:
        kind = jax.devices()[0].device_kind.lower()
    except Exception:  # pragma: no cover
        return 1
    if "v7" in kind or "tpu7" in kind:
        return 2
    return 1


def _plan_tiling(rows_in_array, ncores, itemsize):
    """Pick (tile_rows, chunk, steps) for the (rows, 128) slab."""
    row_align = 8 * max(1, 4 // itemsize)             # f32: 8, bf16: 16, i8: 32
    tile_cap = MAX_TILE_BYTES // (LANES * itemsize)   # rows per block (mult of 512)
    rows_per_core = _round_up(_cdiv(rows_in_array, ncores), row_align)
    if rows_per_core >= tile_cap:
        tile_rows = tile_cap
    elif rows_per_core > CHUNK_ROWS:
        tile_rows = _round_up(rows_per_core, CHUNK_ROWS)
    else:
        tile_rows = rows_per_core
    chunk = min(CHUNK_ROWS, tile_rows)
    steps = _cdiv(rows_per_core, tile_rows)
    assert tile_rows % chunk == 0 and chunk % 8 == 0
    return tile_rows, chunk, steps


def _make_kernel(rows_in_array, tile_rows, chunk, steps, needs_mask):
    """Kernel factory closing over static tiling parameters."""
    nchunks = tile_rows // chunk

    def kernel(pred_ref, target_ref, sum_ref, cnt_ref):
        step = pl.program_id(1)  # reduction axis

        @pl.when(step == 0)
        def _():
            sum_ref[...] = jnp.zeros_like(sum_ref)
            cnt_ref[...] = jnp.zeros_like(cnt_ref)

        # Global row offset of this block in the (rows, 128) slab.
        row_base = (pl.program_id(0) * steps + step) * tile_rows

        if needs_mask:
            # Hoisted out of the loop (JAX does not CSE broadcast_in_dim).
            row_iota = jax.lax.broadcasted_iota(jnp.int32, (chunk, LANES), 0)

        def body(c, carry):
            r0 = c * chunk
            sl = pl.ds(pl.multiple_of(r0, chunk), chunk)
            t = target_ref[sl, :].astype(jnp.float32)
            p = pred_ref[sl, :].astype(jnp.float32)
            valid = t > 0.0
            if needs_mask:
                # Boundary blocks of the last grid step read past the end of
                # the (rows, 128) slab; rows with global index >=
                # rows_in_array hold unspecified data and must be excluded.
                rows_left = rows_in_array - (row_base + r0)
                valid = jnp.logical_and(valid, row_iota < rows_left)
            diff = jnp.where(valid, t - p, 0.0)
            # (chunk, 128) -> (chunk//8, 8, 128): vreg-aligned split, so the
            # axis-0 sum is pure elementwise vreg adds on the VPU (no XLU),
            # accumulating straight into the resident output accumulators.
            sq = (diff * diff).reshape(-1, 8, LANES)
            vm = valid.astype(jnp.float32).reshape(-1, 8, LANES)
            sum_ref[...] += jnp.sum(sq, axis=0)
            cnt_ref[...] += jnp.sum(vm, axis=0)
            return carry

        jax.lax.fori_loop(0, nchunks, body, 0, unroll=True)

    return kernel


def l2_loss(pred, target):
    assert pred.ndim == target.ndim, "inconsistent dimensions"
    assert pred.shape == target.shape

    n = int(pred.size)
    if n == 0:
        # Mean over an empty selection -> NaN (matches torch).
        return jnp.float32(jnp.nan)

    itemsize = max(pred.dtype.itemsize, target.dtype.itemsize)

    # Flatten (free for contiguous arrays) and keep native dtype.
    p_flat = pred.reshape(-1)
    t_flat = target.reshape(-1)

    # Lane pad only when n is not a multiple of 128 (pad value 0 is excluded
    # by the target > 0 mask). This is the only case that costs a copy.
    rem = n % LANES
    if rem:
        p_flat = jnp.pad(p_flat, (0, LANES - rem))
        t_flat = jnp.pad(t_flat, (0, LANES - rem))
    rows = _cdiv(n, LANES)

    p2 = p_flat.reshape(rows, LANES)
    t2 = t_flat.reshape(rows, LANES)

    # Tiny inputs: pad the slab up to one (8, 128) tile (trivial copy) so the
    # block shape stays (8k, 128)-aligned.
    if rows < 8:
        p2 = jnp.pad(p2, ((0, 8 - rows), (0, 0)))
        t2 = jnp.pad(t2, ((0, 8 - rows), (0, 0)))
        rows = 8

    ncores = _tensorcores_per_device()
    tile_rows, chunk, steps = _plan_tiling(rows, ncores, itemsize)
    if ncores > 1 and (ncores - 1) * steps * tile_rows >= rows:
        # Not enough rows to give every core real work; use one core.
        ncores = 1
        tile_rows, chunk, steps = _plan_tiling(rows, ncores, itemsize)

    needs_mask = (ncores * steps * tile_rows) != rows
    kernel = _make_kernel(rows, tile_rows, chunk, steps, needs_mask)

    in_map = lambda c, i: (c * steps + i, 0)
    out_map = lambda c, i: (c, 0, 0)   # resident across the reduction axis

    core_sem = pltpu.CORE_PARALLEL if ncores > 1 else pltpu.ARBITRARY

    sums, cnts = pl.pallas_call(
        kernel,
        out_shape=[
            jax.ShapeDtypeStruct((ncores, 8, LANES), jnp.float32),  # sum(diff^2)
            jax.ShapeDtypeStruct((ncores, 8, LANES), jnp.float32),  # valid count
        ],
        grid_spec=pltpu.PrefetchScalarGridSpec(
            num_scalar_prefetch=0,
            grid=(ncores, steps),
            in_specs=[
                pl.BlockSpec((tile_rows, LANES), in_map),
                pl.BlockSpec((tile_rows, LANES), in_map),
            ],
            out_specs=[
                pl.BlockSpec((None, 8, LANES), out_map),
                pl.BlockSpec((None, 8, LANES), out_map),
            ],
        ),
        compiler_params=pltpu.CompilerParams(
            dimension_semantics=(core_sem, pltpu.ARBITRARY),
            vmem_limit_bytes=VMEM_LIMIT_BYTES,
        ),
    )(p2, t2)

    # Tiny final cross-lane reduce + divide. 0/0 -> NaN matches torch's mean
    # over an empty selection (intentional, do not "fix").
    total = jnp.sum(sums)
    count = jnp.sum(cnts)
    return total / count


if __name__ == "__main__":
    key = jax.random.PRNGKey(0)
    k1, k2 = jax.random.split(key)

    # Small shape consistent with an NCHW prediction / depth-style target.
    shape = (2, 4, 16, 16)
    pred = jax.random.normal(k1, shape, dtype=jnp.float32)
    # Target with a mix of positive (valid) and non-positive (invalid) values.
    target = jax.random.normal(k2, shape, dtype=jnp.float32)

    loss = l2_loss(pred, target)
    jax.block_until_ready(loss)

    # Reference check in plain JAX.
    valid = target > 0
    diff = jnp.where(valid, target - pred, 0.0)
    ref = jnp.sum(diff * diff) / jnp.sum(valid.astype(jnp.float32))
    assert jnp.allclose(loss, ref, rtol=1e-5, atol=1e-6), (loss, ref)

    print("KERNEL_OK")
</pallas_src>

<mosaic_0001>
module attributes {stable_mosaic.version = 11 : i64} {
  func.func @kernel(%arg0: i32, %arg1: i32, %arg2: memref<16x128xf32, #tpu.memory_space<vmem>>, %arg3: memref<16x128xf32, #tpu.memory_space<vmem>>, %arg4: memref<1x8x128xf32, #tpu.memory_space<vmem>>, %arg5: memref<1x8x128xf32, #tpu.memory_space<vmem>>) attributes {dimension_semantics = [#tpu.dimension_semantics<arbitrary>, #tpu.dimension_semantics<arbitrary>], iteration_bounds = array<i64: 1, 1>, scalar_prefetch = 0 : i64, scratch_operands = 0 : i64, tpu.core_type = #tpu.core_type<tc>, window_params = [{transform_indices = @transform_0, window_bounds = array<i64: 16, 128>}, {transform_indices = @transform_1, window_bounds = array<i64: 16, 128>}, {transform_indices = @transform_2, window_bounds = array<i64: 1, 8, 128>}, {transform_indices = @transform_3, window_bounds = array<i64: 1, 8, 128>}]} {
    %c0_i32 = arith.constant 0 : i32
    %0 = arith.cmpi eq, %arg1, %c0_i32 : i32
    %1 = arith.extui %0 : i1 to i32
    %c0_i32_0 = arith.constant 0 : i32
    %2 = arith.cmpi ne, %1, %c0_i32_0 : i32
    scf.if %2 {
      %cst_18 = arith.constant 0.000000e+00 : f32
      %33 = vector.broadcast %cst_18 : f32 to vector<8x128xf32>
      %c0_19 = arith.constant 0 : index
      %c0_20 = arith.constant 0 : index
      %c0_21 = arith.constant 0 : index
      %34 = vector.load %arg4[%c0_19, %c0_20, %c0_21] : memref<1x8x128xf32, #tpu.memory_space<vmem>>, vector<1x8x128xf32>
      %35 = vector.shape_cast %34 : vector<1x8x128xf32> to vector<8x128xf32>
      %36 = vector.shape_cast %33 : vector<8x128xf32> to vector<1x8x128xf32>
      tpu.vector_store %arg4[%c0_19, %c0_20, %c0_21], %36 {strides = array<i32>} : memref<1x8x128xf32, #tpu.memory_space<vmem>>, vector<1x8x128xf32>,
      %cst_22 = arith.constant 0.000000e+00 : f32
      %37 = vector.broadcast %cst_22 : f32 to vector<8x128xf32>
      %c0_23 = arith.constant 0 : index
      %c0_24 = arith.constant 0 : index
      %c0_25 = arith.constant 0 : index
      %38 = vector.load %arg5[%c0_23, %c0_24, %c0_25] : memref<1x8x128xf32, #tpu.memory_space<vmem>>, vector<1x8x128xf32>
      %39 = vector.shape_cast %38 : vector<1x8x128xf32> to vector<8x128xf32>
      %40 = vector.shape_cast %37 : vector<8x128xf32> to vector<1x8x128xf32>
      tpu.vector_store %arg5[%c0_23, %c0_24, %c0_25], %40 {strides = array<i32>} : memref<1x8x128xf32, #tpu.memory_space<vmem>>, vector<1x8x128xf32>,
    } else {
    }
    %c0_i32_1 = arith.constant 0 : i32
    %c16_i32 = arith.constant 16 : i32
    %3 = arith.muli %c0_i32_1, %c16_i32 : i32
    %4 = tpu.assume_multiple %3, 16 : i32
    %5 = arith.index_cast %4 : i32 to index
    %c0 = arith.constant 0 : index
    %6 = vector.load %arg3[%5, %c0] : memref<16x128xf32, #tpu.memory_space<vmem>>, vector<16x128xf32>
    %7 = arith.index_cast %4 : i32 to index
    %c0_2 = arith.constant 0 : index
    %8 = vector.load %arg2[%7, %c0_2] : memref<16x128xf32, #tpu.memory_space<vmem>>, vector<16x128xf32>
    %cst = arith.constant 0.000000e+00 : f32
    %9 = vector.broadcast %cst : f32 to vector<16x128xf32>
    %10 = arith.cmpf ogt, %6, %9 : vector<16x128xf32>
    %11 = arith.subf %6, %8 : vector<16x128xf32>
    %cst_3 = arith.constant 0.000000e+00 : f32
    %12 = vector.broadcast %cst_3 : f32 to vector<16x128xf32>
    %13 = arith.select %10, %11, %12 : vector<16x128xi1>, vector<16x128xf32>
    %14 = arith.mulf %13, %13 : vector<16x128xf32>
    %15 = vector.shape_cast %14 : vector<16x128xf32> to vector<2x8x128xf32>
    %16 = arith.extui %10 : vector<16x128xi1> to vector<16x128xi32>
    %17 = arith.sitofp %16 : vector<16x128xi32> to vector<16x128xf32>
    %18 = vector.shape_cast %17 : vector<16x128xf32> to vector<2x8x128xf32>
    %c0_4 = arith.constant 0 : index
    %c0_5 = arith.constant 0 : index
    %c0_6 = arith.constant 0 : index
    %19 = vector.load %arg4[%c0_4, %c0_5, %c0_6] : memref<1x8x128xf32, #tpu.memory_space<vmem>>, vector<1x8x128xf32>
    %20 = vector.shape_cast %19 : vector<1x8x128xf32> to vector<8x128xf32>
    %cst_7 = arith.constant dense<0.000000e+00> : vector<8x128xf32>
    %21 = vector.multi_reduction <add>, %15, %cst_7 [0] : vector<2x8x128xf32> to vector<8x128xf32>
    %22 = arith.addf %20, %21 : vector<8x128xf32>
    %c0_8 = arith.constant 0 : index
    %c0_9 = arith.constant 0 : index
    %c0_10 = arith.constant 0 : index
    %23 = vector.load %arg4[%c0_8, %c0_9, %c0_10] : memref<1x8x128xf32, #tpu.memory_space<vmem>>, vector<1x8x128xf32>
    %24 = vector.shape_cast %23 : vector<1x8x128xf32> to vector<8x128xf32>
    %25 = vector.shape_cast %22 : vector<8x128xf32> to vector<1x8x128xf32>
    tpu.vector_store %arg4[%c0_8, %c0_9, %c0_10], %25 {strides = array<i32>} : memref<1x8x128xf32, #tpu.memory_space<vmem>>, vector<1x8x128xf32>,
    %c0_11 = arith.constant 0 : index
    %c0_12 = arith.constant 0 : index
    %c0_13 = arith.constant 0 : index
    %26 = vector.load %arg5[%c0_11, %c0_12, %c0_13] : memref<1x8x128xf32, #tpu.memory_space<vmem>>, vector<1x8x128xf32>
    %27 = vector.shape_cast %26 : vector<1x8x128xf32> to vector<8x128xf32>
    %cst_14 = arith.constant dense<0.000000e+00> : vector<8x128xf32>
    %28 = vector.multi_reduction <add>, %18, %cst_14 [0] : vector<2x8x128xf32> to vector<8x128xf32>
    %29 = arith.addf %27, %28 : vector<8x128xf32>
    %c0_15 = arith.constant 0 : index
    %c0_16 = arith.constant 0 : index
    %c0_17 = arith.constant 0 : index
    %30 = vector.load %arg5[%c0_15, %c0_16, %c0_17] : memref<1x8x128xf32, #tpu.memory_space<vmem>>, vector<1x8x128xf32>
    %31 = vector.shape_cast %30 : vector<1x8x128xf32> to vector<8x128xf32>
    %32 = vector.shape_cast %29 : vector<8x128xf32> to vector<1x8x128xf32>
    tpu.vector_store %arg5[%c0_15, %c0_16, %c0_17], %32 {strides = array<i32>} : memref<1x8x128xf32, #tpu.memory_space<vmem>>, vector<1x8x128xf32>,
    %c1_i32 = arith.constant 1 : i32
    return
  }
  func.func @transform_0(%arg0: i32, %arg1: i32) -> (i32, i32) {
    %c1_i32 = arith.constant 1 : i32
    %0 = arith.muli %arg0, %c1_i32 : i32
    %1 = arith.addi %0, %arg1 : i32
    %c0_i32 = arith.constant 0 : i32
    %c0_i32_0 = arith.constant 0 : i32
    return %1, %c0_i32 : i32, i32
  }
  func.func @transform_1(%arg0: i32, %arg1: i32) -> (i32, i32) {
    %c1_i32 = arith.constant 1 : i32
    %0 = arith.muli %arg0, %c1_i32 : i32
    %1 = arith.addi %0, %arg1 : i32
    %c0_i32 = arith.constant 0 : i32
    %c0_i32_0 = arith.constant 0 : i32
    return %1, %c0_i32 : i32, i32
  }
  func.func @transform_2(%arg0: i32, %arg1: i32) -> (i32, i32, i32) {
    %c0_i32 = arith.constant 0 : i32
    %c0_i32_0 = arith.constant 0 : i32
    %c0_i32_1 = arith.constant 0 : i32
    return %arg0, %c0_i32, %c0_i32_0 : i32, i32, i32
  }
  func.func @transform_3(%arg0: i32, %arg1: i32) -> (i32, i32, i32) {
    %c0_i32 = arith.constant 0 : i32
    %c0_i32_0 = arith.constant 0 : i32
    %c0_i32_1 = arith.constant 0 : i32
    return %arg0, %c0_i32, %c0_i32_0 : i32, i32, i32
  }
}

</mosaic_0001>

<bundles_post_ra>
// kernel: tpu_custom_call.1
= control target key start
LH: loop header
LB: loop body
LE: loop exit
PB: predicated region body
PF: predicated region fallthrough
CT: control target
= control target key end

     0   :  { %9 = vsyncpa [#allocation3], 0  ;;  %s275_s0 = inlined_call_operand.hbm [shape: f32[16,128], index: 0, kind: input, shape index: {}]   ;;  %s276_s1 = inlined_call_operand.hbm [shape: f32[16,128], index: 1, kind: input, shape index: {}]   ;;  %s277_s2 = inlined_call_operand.hbm [shape: f32[1,8,128], index: 2, kind: output, shape index: {0}]   ;;  %s278_s3 = inlined_call_operand.hbm [shape: f32[1,8,128], index: 3, kind: output, shape index: {1}]  }
   0x1   :  { %10 = vsyncpa [#allocation6], 0 }
   0x2   :  { %11 = vsyncpa [#allocation4], 0 }
   0x3   :  { %12 = vsyncpa [#allocation9], 0  ;;  %s21_s14 = sshll.u32 %s275_s0, 4  ;;  %s236_s15 = smov [#allocation2]   ;;  %s22_s14 = int_to_ptr.hbm [resolvable:$true] %s21_s14 }
   0x4   :  { %s23_s16 = sshll.u32 %s236_s15, 4  ;;  %s38_s19 = sshll.u32 %s276_s1, 4  ;;  %s24_s16 = int_to_ptr.vmem [resolvable:$true] %s23_s16  ;;  %s39_s19 = int_to_ptr.hbm [resolvable:$true] %s38_s19 }
   0x5   :  { %s237_s20 = smov 128   ;;  %s238_s21 = smov 8  }
   0x6   :  { %29 = dma.hbm_to_vmem [thread:$0]  %s22_s14, 256, %s24_s16, [#allocation3], %s237_s20, %s237_s20, %s238_s21  }
   0x7   :  { %s239_s22 = smov [#allocation5]  }
   0x8   :  { %s40_s23 = sshll.u32 %s239_s22, 4  ;;  %s41_s23 = int_to_ptr.vmem [resolvable:$true] %s40_s23 }
   0x9   :  { %46 = dma.hbm_to_vmem [thread:$0]  %s39_s19, 256, %s41_s23, [#allocation6], %s237_s20, %s237_s20, %s238_s21  }
   0xa   :  { %228 = dma.done.wait [#allocation3], 256  }
   0xb   :  { %229 = vsyncadd [#allocation3], 4294967040 }
   0xc   :  { %230 = dma.done.wait [#allocation6], 256  }
   0xd   :  { %231 = vsyncadd [#allocation6], 4294967040  ;;  %v65_v0 = vld [vmem:[#allocation5] sm:$0xff]  ;;  %v66_v1 = vld [vmem:[#allocation5 + $0x8] sm:$0xff]  ;;  %v240_v6 = vmov 0.0   ;;  %s241_s0 = smov [#allocation8]  }
   0xe   :  { %v67_v2 = vld [vmem:[#allocation2] sm:$0xff]  ;;  %v68_v3 = vld [vmem:[#allocation2 + $0x8] sm:$0xff]  ;;  %vm69_vm0 = vcmp.gt.f32.partialorder %v65_v0, 0.0  ;;  %vm70_vm1 = vcmp.gt.f32.partialorder %v66_v1, 0.0  ;;  %s105_s1 = sshll.u32 %s241_s0, 4  ;;  %s107_s26 = sshll.u32 %s278_s3, 4  ;;  %s106_s1 = int_to_ptr.vmem [resolvable:$true] %s105_s1  ;;  %s108_s26 = int_to_ptr.hbm [resolvable:$true] %s107_s26 }
   0xf   :  { %v71_v4 = vsub.f32 %v65_v0, %v67_v2  ;;  %v72_v5 = vsub.f32 %v66_v1, %v68_v3  ;;  %v123_v7 = vsel %vm69_vm0, 1.0, %v240_v6  ;;  %v124_v8 = vsel %vm70_vm1, 1.0, %v240_v6  ;;  %s242_s27 = smov [#allocation7]   ;;  %s96_s4 = sshll.u32 %s277_s2, 4  ;;  %s97_s4 = int_to_ptr.hbm [resolvable:$true] %s96_s4 }
  0x10   :  { %v86_v10 = vadd.f32 %v124_v8, %v123_v7  ;;  %s94_s28 = sshll.u32 %s242_s27, 4  ;;  %s95_s28 = int_to_ptr.vmem [resolvable:$true] %s94_s28 }
  0x11   :  { %v73_v9 = vsel %vm69_vm0, %v71_v4, 0.0  ;;  %v74_v11 = vsel %vm70_vm1, %v72_v5, 0.0 }
  0x12   :  { %v75_v12 = vmul.f32 %v73_v9, %v73_v9  ;;  %v76_v13 = vmul.f32 %v74_v11, %v74_v11  ;;  %88 = vst [vmem:[#allocation8] sm:$0xff] %v86_v10 }
  0x13   :  { %110 = dma.vmem_to_hbm [thread:$0]  %s106_s1, 128, %s108_s26, [#allocation9]  }
  0x14   :  { %v82_v14 = vadd.f32 %v76_v13, %v75_v12 }
  0x16   :  { %84 = vst [vmem:[#allocation7] sm:$0xff] %v82_v14 }
  0x17   :  { %99 = dma.vmem_to_hbm [thread:$0]  %s95_s28, 128, %s97_s4, [#allocation4]  }
  0x18   :  { %232 = dma.done.wait [#allocation4], 128  }
  0x19   :  { %233 = vsyncadd [#allocation4], 4294967168 }
  0x1a   :  { %234 = dma.done.wait [#allocation9], 128  }
  0x1b   :  { %235 = vsyncadd [#allocation9], 4294967168 }
  0x1c   :  { %119 = vsyncpa [#allocation3], 1 }
  0x1d   :  { %120 = vsyncpa [#allocation6], 1 }
  0x1e   :  { %121 = vsyncpa [#allocation4], 1 }
  0x1f   :  { %122 = vsyncpa [#allocation9], 1 }

</bundles_post_ra>
